<compile_context>
chip_gen: v7x
topology: tpu7x:2x2x1
jax: 0.10.0
libtpu: 0.0.40
codegen_flags: <defaults>
</compile_context>

<pallas_src>
import functools

import jax
import jax.numpy as jnp
from jax.experimental import pallas as pl
from jax.experimental.pallas import tpu as pltpu

_TINY_F32 = 1.1754943508222875e-38   # torch.finfo(torch.float32).tiny
_NORM_EPS = 1e-12                    # F.normalize eps used by CosineSimilarity


def _l2_normalize_f32(x):
    # x: (..., D) f32.  Matches F.normalize: x / max(||x||, eps), with the
    # per-row divide hoisted out of the per-element work (multiply instead).
    sq = jnp.sum(x * x, axis=-1, keepdims=True)
    inv_norm = 1.0 / jnp.maximum(jnp.sqrt(sq), _NORM_EPS)
    return x * inv_norm


def _intra_sample_loss_kernel(pos_ref, neg_ref, o_ref, *,
                              num_pos, num_neg, inv_temp, inv_pos_cnt, mxu_dtype):
    # pos_ref: (TB, num_pos, D)  anchor + candidate rows (query rows + positive keys)
    # neg_ref: (TB, num_neg, D)  negatives (keys only)
    # o_ref:   (1, 1, TB)        per-sample losses for this batch tile
    pos = pos_ref[...].astype(jnp.float32)
    pos_n = _l2_normalize_f32(pos)                               # (TB, np, D)
    q = (pos_n * inv_temp).astype(mxu_dtype)                     # temperature folded in
    k_pos = pos_n.astype(mxu_dtype)

    # query x positive-key block (contains the self-similarity diagonal)
    mat_pp = jnp.einsum("bqd,bkd->bqk", q, k_pos,
                        preferred_element_type=jnp.float32)      # (TB, np, np)
    row_max = jnp.max(mat_pp, axis=-1, keepdims=True)

    if num_neg > 0:
        neg = neg_ref[...].astype(jnp.float32)
        neg_n = _l2_normalize_f32(neg)
        k_neg = neg_n.astype(mxu_dtype)
        mat_pn = jnp.einsum("bqd,bkd->bqk", q, k_neg,
                            preferred_element_type=jnp.float32)  # (TB, np, Q)
        row_max = jnp.maximum(row_max, jnp.max(mat_pn, axis=-1, keepdims=True))

    # Off-diagonal mask of the positive block: constant per tile, broadcasts
    # over the TB samples (hoisted out of the per-sample work).
    r = jax.lax.broadcasted_iota(jnp.int32, (num_pos, num_pos), 0)
    c = jax.lax.broadcasted_iota(jnp.int32, (num_pos, num_pos), 1)
    not_diag = (r != c)[None]                                    # (1, np, np)

    shifted_pp = mat_pp - row_max
    exp_pp = jnp.where(not_diag, jnp.exp(shifted_pp), 0.0)
    denom = jnp.sum(exp_pp, axis=-1, keepdims=True)              # (TB, np, 1)
    if num_neg > 0:
        denom = denom + jnp.sum(jnp.exp(mat_pn - row_max), axis=-1, keepdims=True)
    log_denom = jnp.log(denom)

    log_prob_pp = shifted_pp - log_denom                         # (TB, np, np)
    sum_pos_logp = jnp.sum(jnp.where(not_diag, log_prob_pp, 0.0), axis=-1)
    losses = -(sum_pos_logp * inv_pos_cnt)                       # (TB, np)

    # AvgNonZeroReducer per sample: mean over losses > 0 (0 if none).
    nz = losses > 0.0
    n_nz = jnp.sum(nz.astype(jnp.float32), axis=-1)              # (TB,)
    sum_nz = jnp.sum(jnp.where(nz, losses, 0.0), axis=-1)        # (TB,)
    sample_loss = jnp.where(n_nz >= 1.0, sum_nz / jnp.maximum(n_nz, 1.0), 0.0)

    o_ref[...] = sample_loss[None, None, :]


def intra_sample_loss(x_lm, candidates_z, negatives_z, temperature=0.1, tile_b=None):
    B, D = x_lm.shape
    P = candidates_z.shape[1]
    Q = negatives_z.shape[1]
    num_pos = 1 + P

    in_dtype = jnp.promote_types(x_lm.dtype,
                                 jnp.promote_types(candidates_z.dtype, negatives_z.dtype))
    mxu_dtype = jnp.bfloat16 if in_dtype == jnp.bfloat16 else jnp.float32
    in_bytes = jnp.dtype(in_dtype).itemsize

    # Glue: only the small anchor + candidates stack is materialized (no f32
    # up-cast); negatives (typically the bulk of the data) pass straight through.
    pos_stack = jnp.concatenate(
        [x_lm[:, None, :].astype(in_dtype), candidates_z.astype(in_dtype)], axis=1)
    neg_stack = negatives_z.astype(in_dtype)

    # Batch tile size: amortize per-grid-step overhead while staying well under
    # the default scoped-VMEM limit on every generation (v5e 16 MiB, v7x 64 MiB
    # physical). Rough per-sample footprint: double-buffered inputs + f32
    # normalized copies + similarity/exp/log intermediates.
    if tile_b is None:
        per_sample_bytes = (2 * (num_pos + Q) * D * in_bytes
                            + 2 * (num_pos + Q) * D * 4
                            + 6 * num_pos * (num_pos + Q) * 4)
        budget = 12 * 1024 * 1024
        tile_b = max(8, min(512, budget // max(per_sample_bytes, 1)))
        tile_b = (tile_b // 8) * 8

    if B <= tile_b:
        TB, num_tiles = B, 1
    else:
        TB = tile_b
        num_tiles = pl.cdiv(B, TB)

    B_pad = num_tiles * TB
    if B_pad != B:
        pad = B_pad - B
        pos_stack = jnp.pad(pos_stack, ((0, pad), (0, 0), (0, 0)))
        neg_stack = jnp.pad(neg_stack, ((0, pad), (0, 0), (0, 0)))

    kernel = functools.partial(
        _intra_sample_loss_kernel,
        num_pos=num_pos,
        num_neg=Q,
        inv_temp=float(1.0 / temperature),
        inv_pos_cnt=float(1.0 / (num_pos - 1 + _TINY_F32)),
        mxu_dtype=mxu_dtype,
    )

    per_sample_losses = pl.pallas_call(
        kernel,
        out_shape=jax.ShapeDtypeStruct((num_tiles, 1, TB), jnp.float32),
        grid=(num_tiles,),
        in_specs=[
            pl.BlockSpec((TB, num_pos, D), lambda t: (t, 0, 0)),
            pl.BlockSpec((TB, Q, D), lambda t: (t, 0, 0)),
        ],
        out_specs=pl.BlockSpec((1, 1, TB), lambda t: (t, 0, 0)),
        compiler_params=pltpu.CompilerParams(
            dimension_semantics=("parallel",),
        ),
    )(pos_stack, neg_stack)

    # Final batch mean in JAX; padded samples are sliced off.
    return jnp.sum(per_sample_losses.reshape(-1)[:B]) / B


def _reference_loss(x_lm, candidates_z, negatives_z, temperature=0.1):
    # Pure-JAX reference mirroring pytorch_metric_learning SupConLoss per sample.
    B = x_lm.shape[0]
    P = candidates_z.shape[1]
    Q = negatives_z.shape[1]
    num_pos = 1 + P
    N = num_pos + Q
    emb_all = jnp.concatenate([x_lm[:, None, :], candidates_z, negatives_z], axis=1)
    labels = jnp.where(jnp.arange(N) < num_pos, 0, jnp.arange(N))
    keep = ~jnp.eye(N, dtype=bool)
    pos_mask = ((labels[:, None] == labels[None, :]) & keep).astype(jnp.float32)
    total = 0.0
    for b in range(B):
        e = emb_all[b].astype(jnp.float32)
        e = e / jnp.maximum(jnp.linalg.norm(e, axis=-1, keepdims=True), _NORM_EPS)
        mat = (e @ e.T) / temperature
        mat = mat - mat.max(axis=1, keepdims=True)
        denom = jnp.log(jnp.sum(jnp.where(keep, jnp.exp(mat), 0.0), axis=1, keepdims=True))
        logp = mat - denom
        mlp = jnp.sum(pos_mask * logp, axis=1) / (pos_mask.sum(axis=1) + _TINY_F32)
        losses = -mlp
        nz = losses > 0
        n_nz = jnp.sum(nz.astype(jnp.float32))
        sample = jnp.where(
            n_nz >= 1.0, jnp.sum(jnp.where(nz, losses, 0.0)) / jnp.maximum(n_nz, 1.0), 0.0
        )
        total = total + sample
    return total / B


if __name__ == "__main__":
    key = jax.random.PRNGKey(0)
    k1, k2, k3 = jax.random.split(key, 3)
    B, P, Q, D = 2, 3, 4, 32     # N = 1 + P + Q = 8 embeddings per sample
    x_lm = jax.random.normal(k1, (B, D), dtype=jnp.float32)
    candidates_z = jax.random.normal(k2, (B, P, D), dtype=jnp.float32)
    negatives_z = jax.random.normal(k3, (B, Q, D), dtype=jnp.float32)

    loss = jax.block_until_ready(
        intra_sample_loss(x_lm, candidates_z, negatives_z, temperature=0.1)
    )
    ref = jax.block_until_ready(
        _reference_loss(x_lm, candidates_z, negatives_z, temperature=0.1)
    )
    assert jnp.allclose(loss, ref, rtol=1e-4, atol=1e-4), (loss, ref)

    print("KERNEL_OK")
</pallas_src>

<mosaic_0001>
module attributes {stable_mosaic.version = 11 : i64} {
  func.func @_intra_sample_loss_kernel(%arg0: i32, %arg1: memref<2x4x32xf32, #tpu.memory_space<vmem>>, %arg2: memref<2x4x32xf32, #tpu.memory_space<vmem>>, %arg3: memref<1x1x2xf32, #tpu.memory_space<vmem>>) attributes {dimension_semantics = [#tpu.dimension_semantics<parallel>], iteration_bounds = array<i64: 1>, scalar_prefetch = 0 : i64, scratch_operands = 0 : i64, tpu.core_type = #tpu.core_type<tc>, window_params = [{transform_indices = @transform_0, window_bounds = array<i64: 2, 4, 32>}, {transform_indices = @transform_1, window_bounds = array<i64: 2, 4, 32>}, {transform_indices = @transform_2, window_bounds = array<i64: 1, 1, 2>}]} {
    %c0 = arith.constant 0 : index
    %c0_0 = arith.constant 0 : index
    %c0_1 = arith.constant 0 : index
    %0 = vector.load %arg1[%c0, %c0_0, %c0_1] : memref<2x4x32xf32, #tpu.memory_space<vmem>>, vector<2x4x32xf32>
    %1 = arith.mulf %0, %0 : vector<2x4x32xf32>
    %cst = arith.constant dense<0.000000e+00> : vector<2x4xf32>
    %2 = vector.multi_reduction <add>, %1, %cst [2] : vector<2x4x32xf32> to vector<2x4xf32>
    %3 = vector.shape_cast %2 : vector<2x4xf32> to vector<2x4x1xf32>
    %4 = math.sqrt %3 : vector<2x4x1xf32>
    %cst_2 = arith.constant 9.99999996E-13 : f32
    %5 = vector.broadcast %cst_2 : f32 to vector<2x4x1xf32>
    %6 = arith.maximumf %4, %5 : vector<2x4x1xf32>
    %cst_3 = arith.constant 1.000000e+00 : f32
    %7 = vector.broadcast %cst_3 : f32 to vector<2x4x1xf32>
    %8 = arith.divf %7, %6 : vector<2x4x1xf32>
    %9 = vector.broadcast %8 : vector<2x4x1xf32> to vector<2x4x32xf32>
    %10 = arith.mulf %0, %9 : vector<2x4x32xf32>
    %cst_4 = arith.constant 1.000000e+01 : f32
    %11 = vector.broadcast %cst_4 : f32 to vector<2x4x32xf32>
    %12 = arith.mulf %10, %11 : vector<2x4x32xf32>
    "tpu.trace_start"() <{level = 10 : i32, message = "bqd,bkd->bqk"}> : () -> ()
    %cst_5 = arith.constant dense<0.000000e+00> : vector<2x4x4xf32>
    %13 = tpu.matmul %12, %10, %cst_5 {dimension_numbers = #tpu.dot_dimension_numbers<[2], [2], [1], [1], [0, 0, 0, 1, 1, 1], [0], [0]>} : vector<2x4x32xf32>, vector<2x4x32xf32>, vector<2x4x4xf32> -> vector<2x4x4xf32>
    "tpu.trace_stop"() : () -> ()
    %cst_6 = arith.constant dense<0xFF800000> : vector<2x4xf32>
    %14 = vector.multi_reduction <maximumf>, %13, %cst_6 [2] : vector<2x4x4xf32> to vector<2x4xf32>
    %15 = vector.shape_cast %14 : vector<2x4xf32> to vector<2x4x1xf32>
    %c0_7 = arith.constant 0 : index
    %c0_8 = arith.constant 0 : index
    %c0_9 = arith.constant 0 : index
    %16 = vector.load %arg2[%c0_7, %c0_8, %c0_9] : memref<2x4x32xf32, #tpu.memory_space<vmem>>, vector<2x4x32xf32>
    %17 = arith.mulf %16, %16 : vector<2x4x32xf32>
    %cst_10 = arith.constant dense<0.000000e+00> : vector<2x4xf32>
    %18 = vector.multi_reduction <add>, %17, %cst_10 [2] : vector<2x4x32xf32> to vector<2x4xf32>
    %19 = vector.shape_cast %18 : vector<2x4xf32> to vector<2x4x1xf32>
    %20 = math.sqrt %19 : vector<2x4x1xf32>
    %cst_11 = arith.constant 9.99999996E-13 : f32
    %21 = vector.broadcast %cst_11 : f32 to vector<2x4x1xf32>
    %22 = arith.maximumf %20, %21 : vector<2x4x1xf32>
    %cst_12 = arith.constant 1.000000e+00 : f32
    %23 = vector.broadcast %cst_12 : f32 to vector<2x4x1xf32>
    %24 = arith.divf %23, %22 : vector<2x4x1xf32>
    %25 = vector.broadcast %24 : vector<2x4x1xf32> to vector<2x4x32xf32>
    %26 = arith.mulf %16, %25 : vector<2x4x32xf32>
    "tpu.trace_start"() <{level = 10 : i32, message = "bqd,bkd->bqk"}> : () -> ()
    %cst_13 = arith.constant dense<0.000000e+00> : vector<2x4x4xf32>
    %27 = tpu.matmul %12, %26, %cst_13 {dimension_numbers = #tpu.dot_dimension_numbers<[2], [2], [1], [1], [0, 0, 0, 1, 1, 1], [0], [0]>} : vector<2x4x32xf32>, vector<2x4x32xf32>, vector<2x4x4xf32> -> vector<2x4x4xf32>
    "tpu.trace_stop"() : () -> ()
    %cst_14 = arith.constant dense<0xFF800000> : vector<2x4xf32>
    %28 = vector.multi_reduction <maximumf>, %27, %cst_14 [2] : vector<2x4x4xf32> to vector<2x4xf32>
    %29 = vector.shape_cast %28 : vector<2x4xf32> to vector<2x4x1xf32>
    %30 = arith.maximumf %15, %29 : vector<2x4x1xf32>
    %31 = tpu.iota {dimensions = array<i32: 0>} : vector<4x4xi32>
    %32 = tpu.iota {dimensions = array<i32: 1>} : vector<4x4xi32>
    %33 = arith.cmpi ne, %31, %32 : vector<4x4xi32>
    %34 = vector.shape_cast %33 : vector<4x4xi1> to vector<1x4x4xi1>
    %35 = vector.broadcast %30 : vector<2x4x1xf32> to vector<2x4x4xf32>
    %36 = arith.subf %13, %35 : vector<2x4x4xf32>
    %37 = math.exp %36 : vector<2x4x4xf32>
    %cst_15 = arith.constant 0.000000e+00 : f32
    %38 = vector.shape_cast %34 : vector<1x4x4xi1> to vector<1x4x4xi1>
    %39 = vector.broadcast %38 : vector<1x4x4xi1> to vector<2x4x4xi1>
    %40 = vector.broadcast %cst_15 : f32 to vector<2x4x4xf32>
    %41 = arith.select %39, %37, %40 : vector<2x4x4xi1>, vector<2x4x4xf32>
    %cst_16 = arith.constant dense<0.000000e+00> : vector<2x4xf32>
    %42 = vector.multi_reduction <add>, %41, %cst_16 [2] : vector<2x4x4xf32> to vector<2x4xf32>
    %43 = vector.shape_cast %42 : vector<2x4xf32> to vector<2x4x1xf32>
    %44 = vector.broadcast %30 : vector<2x4x1xf32> to vector<2x4x4xf32>
    %45 = arith.subf %27, %44 : vector<2x4x4xf32>
    %46 = math.exp %45 : vector<2x4x4xf32>
    %cst_17 = arith.constant dense<0.000000e+00> : vector<2x4xf32>
    %47 = vector.multi_reduction <add>, %46, %cst_17 [2] : vector<2x4x4xf32> to vector<2x4xf32>
    %48 = vector.shape_cast %47 : vector<2x4xf32> to vector<2x4x1xf32>
    %49 = arith.addf %43, %48 : vector<2x4x1xf32>
    %50 = math.log %49 : vector<2x4x1xf32>
    %51 = vector.broadcast %50 : vector<2x4x1xf32> to vector<2x4x4xf32>
    %52 = arith.subf %36, %51 : vector<2x4x4xf32>
    %cst_18 = arith.constant 0.000000e+00 : f32
    %53 = vector.shape_cast %34 : vector<1x4x4xi1> to vector<1x4x4xi1>
    %54 = vector.broadcast %53 : vector<1x4x4xi1> to vector<2x4x4xi1>
    %55 = vector.broadcast %cst_18 : f32 to vector<2x4x4xf32>
    %56 = arith.select %54, %52, %55 : vector<2x4x4xi1>, vector<2x4x4xf32>
    %cst_19 = arith.constant dense<0.000000e+00> : vector<2x4xf32>
    %57 = vector.multi_reduction <add>, %56, %cst_19 [2] : vector<2x4x4xf32> to vector<2x4xf32>
    %cst_20 = arith.constant 0.333333343 : f32
    %58 = vector.broadcast %cst_20 : f32 to vector<2x4xf32>
    %59 = arith.mulf %57, %58 : vector<2x4xf32>
    %cst_21 = arith.constant 0.000000e+00 : f32
    %60 = vector.broadcast %cst_21 : f32 to vector<2x4xf32>
    %61 = arith.subf %60, %59 : vector<2x4xf32>
    %cst_22 = arith.constant 0.000000e+00 : f32
    %62 = vector.broadcast %cst_22 : f32 to vector<2x4xf32>
    %63 = arith.cmpf ogt, %61, %62 : vector<2x4xf32>
    %64 = arith.extui %63 : vector<2x4xi1> to vector<2x4xi32>
    %65 = arith.sitofp %64 : vector<2x4xi32> to vector<2x4xf32>
    %cst_23 = arith.constant dense<0.000000e+00> : vector<2xf32>
    %66 = vector.multi_reduction <add>, %65, %cst_23 [1] : vector<2x4xf32> to vector<2xf32>
    %cst_24 = arith.constant 0.000000e+00 : f32
    %67 = vector.broadcast %cst_24 : f32 to vector<2x4xf32>
    %68 = arith.select %63, %61, %67 : vector<2x4xi1>, vector<2x4xf32>
    %cst_25 = arith.constant dense<0.000000e+00> : vector<2xf32>
    %69 = vector.multi_reduction <add>, %68, %cst_25 [1] : vector<2x4xf32> to vector<2xf32>
    %cst_26 = arith.constant 1.000000e+00 : f32
    %70 = vector.broadcast %cst_26 : f32 to vector<2xf32>
    %71 = arith.cmpf oge, %66, %70 : vector<2xf32>
    %cst_27 = arith.constant 1.000000e+00 : f32
    %72 = vector.broadcast %cst_27 : f32 to vector<2xf32>
    %73 = arith.maximumf %66, %72 : vector<2xf32>
    %74 = arith.divf %69, %73 : vector<2xf32>
    %cst_28 = arith.constant 0.000000e+00 : f32
    %75 = vector.broadcast %cst_28 : f32 to vector<2xf32>
    %76 = arith.select %71, %74, %75 : vector<2xi1>, vector<2xf32>
    %77 = vector.shape_cast %76 : vector<2xf32> to vector<1x1x2xf32>
    %c0_29 = arith.constant 0 : index
    %c0_30 = arith.constant 0 : index
    %c0_31 = arith.constant 0 : index
    %78 = vector.load %arg3[%c0_29, %c0_30, %c0_31] : memref<1x1x2xf32, #tpu.memory_space<vmem>>, vector<1x1x2xf32>
    tpu.vector_store %arg3[%c0_29, %c0_30, %c0_31], %77 {strides = array<i32>} : memref<1x1x2xf32, #tpu.memory_space<vmem>>, vector<1x1x2xf32>,
    return
  }
  func.func @transform_0(%arg0: i32) -> (i32, i32, i32) {
    %c0_i32 = arith.constant 0 : i32
    %c0_i32_0 = arith.constant 0 : i32
    %c0_i32_1 = arith.constant 0 : i32
    return %arg0, %c0_i32, %c0_i32_0 : i32, i32, i32
  }
  func.func @transform_1(%arg0: i32) -> (i32, i32, i32) {
    %c0_i32 = arith.constant 0 : i32
    %c0_i32_0 = arith.constant 0 : i32
    %c0_i32_1 = arith.constant 0 : i32
    return %arg0, %c0_i32, %c0_i32_0 : i32, i32, i32
  }
  func.func @transform_2(%arg0: i32) -> (i32, i32, i32) {
    %c0_i32 = arith.constant 0 : i32
    %c0_i32_0 = arith.constant 0 : i32
    %c0_i32_1 = arith.constant 0 : i32
    return %arg0, %c0_i32, %c0_i32_0 : i32, i32, i32
  }
}

</mosaic_0001>

<bundles_post_ra>
// kernel: tpu_custom_call.1
= control target key start
LH: loop header
LB: loop body
LE: loop exit
PB: predicated region body
PF: predicated region fallthrough
CT: control target
= control target key end

     0   :  { %7 = vsyncpa [#allocation3], 0  ;;  %s811_s0 = inlined_call_operand.hbm [shape: f32[2,4,32], index: 0, kind: input, shape index: {}]   ;;  %s812_s1 = inlined_call_operand.hbm [shape: f32[2,4,32], index: 1, kind: input, shape index: {}]   ;;  %s813_s2 = inlined_call_operand.hbm [shape: f32[1,1,2], index: 2, kind: output, shape index: {}]  }
   0x1   :  { %8 = vsyncpa [#allocation6], 0 }
   0x2   :  { %9 = vsyncpa [#allocation4], 0  ;;  %s690_s9 = smov [#allocation2]   ;;  %s618_s13 = scalar_lea.hbm %s811_s0, 128 }
   0x3   :  { %s15_s10 = sshll.u32 %s690_s9, 4  ;;  %p619_p0 = scmp.ne.s32.totalorder %s811_s0, %s618_s13  ;;  %s16_s10 = int_to_ptr.vmem [resolvable:$true] %s15_s10 }
   0x4   :  { %p622_p1 = scmp.lt.u32.totalorder %s618_s13, %s811_s0 }
   0x6   :  { %p624_p2 = pnand %p622_p1, %p619_p0 }
   0x8   :  { %627 = shalt.err (!%p624_p2)
}
   0x9   :  { %s628_s18 = scalar_lea.vmem %s16_s10, 128  ;;  %p633_p4 = scmp.lt.s32.totalorder %s16_s10, %s16_s10 }
   0xa   :  { %p629_p3 = scmp.ne.s32.totalorder %s16_s10, %s628_s18  ;;  %p634_p5 = scmp.lt.s32.totalorder %s628_s18, %s628_s18 }
   0xc   :  { %p635_p6 = por %p634_p5, %p633_p4 }
   0xe   :  { %p636_p7 = pnand %p635_p6, %p629_p3 }
  0x10   :  { %639 = shalt.err (!%p636_p7)
}
  0x11   :  { %s691_s19 = smov 64   ;;  %s692_s20 = smov 4  }
  0x12   :  { %21 = dma.hbm_to_vmem [thread:$0]  %s811_s0, 128, %s16_s10, [#allocation3], %s691_s19, %s691_s19, %s692_s20  }
  0x13   :  { %s693_s23 = smov [#allocation5]   ;;  %s640_s27 = scalar_lea.hbm %s812_s1, 128 }
  0x14   :  { %s27_s24 = sshll.u32 %s693_s23, 4  ;;  %p641_p8 = scmp.ne.s32.totalorder %s812_s1, %s640_s27  ;;  %s28_s24 = int_to_ptr.vmem [resolvable:$true] %s27_s24 }
  0x15   :  { %p644_p9 = scmp.lt.u32.totalorder %s640_s27, %s812_s1 }
  0x17   :  { %p646_p10 = pnand %p644_p9, %p641_p8 }
  0x19   :  { %649 = shalt.err (!%p646_p10)
}
  0x1a   :  { %s650_s4 = scalar_lea.vmem %s28_s24, 128  ;;  %p655_p12 = scmp.lt.s32.totalorder %s28_s24, %s28_s24 }
  0x1b   :  { %p651_p11 = scmp.ne.s32.totalorder %s28_s24, %s650_s4  ;;  %p656_p13 = scmp.lt.s32.totalorder %s650_s4, %s650_s4 }
  0x1d   :  { %p657_p0 = por %p656_p13, %p655_p12 }
  0x1f   :  { %p658_p1 = pnand %p657_p0, %p651_p11 }
  0x21   :  { %661 = shalt.err (!%p658_p1)
}
  0x22   :  { %33 = dma.hbm_to_vmem [thread:$0]  %s812_s1, 128, %s28_s24, [#allocation6], %s691_s19, %s691_s19, %s692_s20  }
  0x23   :  { %684 = dma.done.wait [#allocation3], 128  }
  0x24   :  { %685 = vsyncadd [#allocation3], 4294967168 }
  0x25   :  { %686 = dma.done.wait [#allocation6], 128  }
  0x26   :  { %687 = vsyncadd [#allocation6], 4294967168  ;;  %vm44_vm0 = vcmask 257024   ;;  %v736_v0 = vld [vmem:[#allocation5] sm:$0xf]  ;;  %v694_v12 = vmov 0.0   ;;  %v421_v63 = vlaneseq }
  0x27   :  { %v738_v1 = vld [vmem:[#allocation2] sm:$0xf]  ;;  %v740_v2 = vld [vmem:[#allocation5 + $0x4] sm:$0xf]  ;;  %v237_v3 = vmul.f32 %v736_v0, %v736_v0  ;;  %v748_v6 = vld [vmem:[#allocation2 + $0x4] sm:$0xf]  ;;  %561 = vmatprep.subr.mxu0 %v694_v12  ;;  %566 = vmatprep.subr.mxu1 %v694_v12 }
  0x28   :  { %v42_v4 = vmul.f32 %v738_v1, %v738_v1  ;;  %v238_v5 = vmul.f32 %v740_v2, %v740_v2  ;;  %v43_v7 = vmul.f32 %v748_v6, %v748_v6  ;;  %vm695_vm1 = vmmov 0   ;;  %s696_s1 = smov [#allocation7]  }
  0x29   :  { %v239_v8 = vsel %vm44_vm0, %v237_v3, 0.0  ;;  %563 = vmatprep.mubr.msk.f32.mxu0 %vm695_vm1, %v694_v12  ;;  %568 = vmatprep.mubr.msk.f32.mxu1 %vm695_vm1, %v694_v12  ;;  %vm75_vm10 = vcmask 261120   ;;  %vm228_vm11 = vcmask 27648   ;;  %vm490_vm15 = vcmask 1041409   ;;  %s533_s6 = sshll.u32 %s696_s1, 4  ;;  %s534_s6 = int_to_ptr.vmem [resolvable:$true] %s533_s6 }
  0x2a   :  { %v45_v9 = vsel %vm44_vm0, %v42_v4, 0.0  ;;  %240 = vadd.xlane.f32.xlu1 %v239_v8  ;;  %v242_v10 = vsel %vm44_vm0, %v238_v5, 0.0  ;;  %v48_v11 = vsel %vm44_vm0, %v43_v7, 0.0  ;;  %vm493_vm0 = vcmask 25600   ;;  %s662_s7 = scalar_lea.vmem %s534_s6, 16  ;;  %s666_s8 = scalar_lea.vmem %s534_s6, 32 }
  0x2b   :  { %46 = vadd.xlane.f32.xlu0 %v45_v9  ;;  %p663_p2 = scmp.ne.s32.totalorder %s534_s6, %s662_s7  ;;  %p667_p3 = scmp.lt.s32.totalorder %s534_s6, %s534_s6 }
  0x2c   :  { %p668_p4 = scmp.lt.s32.totalorder %s666_s8, %s662_s7 }
  0x2e   :  { %243 = vadd.xlane.f32.xlu1 %v242_v10  ;;  %p669_p5 = por %p668_p4, %p667_p3 }
  0x2f   :  { %49 = vadd.xlane.f32.xlu0 %v48_v11 }
  0x30   :  { %p670_p6 = pnand %p669_p5, %p663_p2 }
  0xb7   :  { %v241_v13 = vpop.xlane.xlu1 %240 }
  0xb8   :  { %v47_v14 = vpop.xlane.xlu0 %46  ;;  %588 = vrsqrt.f32 %v241_v13  ;;  %vm247_vm2 = vcmp.eq.f32.partialorder %v241_v13, inf  ;;  %v250_v20 = vand.u32 2147483648, %v241_v13  ;;  %vm249_vm3 = vcmp.eq.f32.partialorder %v241_v13, 0.0 }
  0xb9   :  { %590 = vrsqrt.f32 %v47_v14  ;;  %vm53_vm4 = vcmp.eq.f32.partialorder %v47_v14, inf  ;;  %v56_v23 = vand.u32 2147483648, %v47_v14  ;;  %vm55_vm5 = vcmp.eq.f32.partialorder %v47_v14, 0.0 }
  0xbb   :  { %v244_v15 = vpop.xlane.xlu1 %243 }
  0xbc   :  { %v50_v16 = vpop.xlane.xlu0 %49  ;;  %592 = vrsqrt.f32 %v244_v15  ;;  %vm254_vm6 = vcmp.eq.f32.partialorder %v244_v15, inf  ;;  %v257_v32 = vand.u32 2147483648, %v244_v15  ;;  %vm256_vm7 = vcmp.eq.f32.partialorder %v244_v15, 0.0 }
  0xbd   :  { %594 = vrsqrt.f32 %v50_v16  ;;  %vm60_vm8 = vcmp.eq.f32.partialorder %v50_v16, inf  ;;  %v63_v35 = vand.u32 2147483648, %v50_v16  ;;  %vm62_vm9 = vcmp.eq.f32.partialorder %v50_v16, 0.0 }
  0xc2   :  { %v589_v17 = vpop.eup %588 }
  0xc3   :  { %v591_v18 = vpop.eup %590  ;;  %v246_v19 = vmul.f32 %v589_v17, %v241_v13 }
  0xc4   :  { %v52_v21 = vmul.f32 %v591_v18, %v47_v14 }
  0xc5   :  { %v248_v22 = vsel %vm247_vm2, %v241_v13, %v246_v19  ;;  %vm525_vm2 = vcmask 8192  }
  0xc6   :  { %v593_v24 = vpop.eup %592  ;;  %v251_v25 = vsel %vm249_vm3, %v250_v20, %v248_v22  ;;  %v54_v26 = vsel %vm53_vm4, %v47_v14, %v52_v21 }
  0xc7   :  { %v595_v27 = vpop.eup %594  ;;  %v57_v28 = vsel %vm55_vm5, %v56_v23, %v54_v26  ;;  %v253_v29 = vmul.f32 %v593_v24, %v244_v15  ;;  %v259_v30 = vmax.f32 %v251_v25, 1e-12 }
  0xc8   :  { %v65_v31 = vmax.f32 %v57_v28, 1e-12  ;;  %v59_v33 = vmul.f32 %v595_v27, %v50_v16 }
  0xc9   :  { %v255_v34 = vsel %vm254_vm6, %v244_v15, %v253_v29 }
  0xca   :  { %596 = vrcp.f32 %v65_v31  ;;  %v258_v36 = vsel %vm256_vm7, %v257_v32, %v255_v34  ;;  %v61_v37 = vsel %vm60_vm8, %v50_v16, %v59_v33 }
  0xcb   :  { %v64_v38 = vsel %vm62_vm9, %v63_v35, %v61_v37  ;;  %598 = vrcp.f32 %v259_v30  ;;  %v260_v39 = vmax.f32 %v258_v36, 1e-12 }
  0xcc   :  { %v66_v40 = vmax.f32 %v64_v38, 1e-12 }
  0xce   :  { %600 = vrcp.f32 %v66_v40 }
  0xcf   :  { %602 = vrcp.f32 %v260_v39 }
  0xd4   :  { %v597_v41 = vpop.eup %596 }
  0xd5   :  { %v71_v42 = vmul.f32 %v597_v41, %v738_v1  ;;  %v599_v43 = vpop.eup %598  ;;  %v424_v1 = vand.u32 127, %v421_v63 }
  0xd6   :  { %v265_v47 = vmul.f32 %v599_v43, %v736_v0  ;;  %v422_v0 = vshrl.u32 %v421_v63, 7 }
  0xd7   :  { %v73_v44 = vmul.f32 10.0, %v71_v42  ;;  %562 = vmatpush3.xpose.msk.msra.mxu0 %vm75_vm10, %v71_v42 }
  0xd8   :  { %v601_v45 = vpop.eup %600  ;;  %571 = vmatprep.subr.mxu0 %v694_v12  ;;  %vm425_vm12 = vcmp.ne.s32.totalorder %v422_v0, %v424_v1 }
  0xd9   :  { %v72_v46 = vmul.f32 %v601_v45, %v748_v6  ;;  %v603_v48 = vpop.eup %602 }
  0xda   :  { %564 = vmatmul.mubr.msk.f32.vlgmr.msra.gmra.mrb[0].mxu0 %vm75_vm10, %v73_v44  ;;  %v266_v50 = vmul.f32 %v603_v48, %v740_v2  ;;  %v780_v2 = vsub.s32 %v424_v1, %v422_v0 }
  0xdb   :  { %v74_v49 = vmul.f32 10.0, %v72_v46  ;;  %567 = vmatpush3.xpose.msk.msra.mxu1 %vm75_vm10, %v72_v46  ;;  %572 = vmatpush3.xpose.msk.msra.mxu0 %vm75_vm10, %v265_v47 }
  0xdc   :  { %573 = vmatprep.mubr.msk.f32.mxu0 %vm695_vm1, %v694_v12  ;;  %576 = vmatprep.subr.mxu1 %v694_v12 }
  0xde   :  { %569 = vmatmul.mubr.msk.f32.vlgmr.msra.gmra.mrb[0].mxu1 %vm75_vm10, %v74_v49  ;;  %574 = vmatmul.mubr.msk.f32.vlgmr.msra.gmra.mrb[2].mxu0 %vm75_vm10, %v73_v44 }
  0xdf   :  { %577 = vmatpush3.xpose.msk.msra.mxu1 %vm75_vm10, %v266_v50  ;;  %578 = vmatprep.mubr.msk.f32.mxu1 %vm695_vm1, %v694_v12 }
  0xe2   :  { %579 = vmatmul.mubr.msk.f32.vlgmr.msra.gmra.mrb[2].mxu1 %vm75_vm10, %v74_v49 }
 0x1ad   :  { %v148_v51 = vpop.f32.mrb[0].mxu0 }
 0x1ae   :  { %v565_v52 = vpop.f32.mrb[1].mxu0  ;;  %v229_v53 = vsel %vm228_vm11, %v148_v51, -inf }
 0x1af   :  { %230 = vmax.xlane.f32.xlu0 %v229_v53 }
 0x1b1   :  { %v224_v54 = vpop.f32.mrb[0].mxu1  ;;  %v336_v55 = vpop.f32.mrb[2].mxu0 }
 0x1b2   :  { %v570_v56 = vpop.f32.mrb[1].mxu1  ;;  %v575_v57 = vpop.f32.mrb[3].mxu0  ;;  %v413_v58 = vsel %vm228_vm11, %v336_v55, -inf  ;;  %v232_v59 = vsel %vm228_vm11, %v224_v54, -inf }
 0x1b3   :  { %414 = vmax.xlane.f32.xlu0 %v413_v58  ;;  %233 = vmax.xlane.f32.xlu1 %v232_v59 }
 0x1b5   :  { %v409_v60 = vpop.f32.mrb[2].mxu1 }
 0x1b6   :  { %v580_v61 = vpop.f32.mrb[3].mxu1  ;;  %v416_v62 = vsel %vm228_vm11, %v409_v60, -inf }
 0x1b7   :  { %417 = vmax.xlane.f32.xlu1 %v416_v62 }
 0x23c   :  { %v231_v3 = vpop.xlane.xlu0 %230 }
 0x240   :  { %v234_v4 = vpop.xlane.xlu1 %233  ;;  %v415_v5 = vpop.xlane.xlu0 %414 }
 0x241   :  { %v419_v6 = vmax.f32 %v231_v3, %v415_v5 }
 0x243   :  { %v426_v7 = vsub.f32 %v148_v51, %v419_v6  ;;  %v442_v8 = vsub.f32 %v336_v55, %v419_v6 }
 0x244   :  { %v418_v9 = vpop.xlane.xlu1 %417 }
 0x245   :  { %v428_v10 = vmul.f32 1.442695, %v426_v7  ;;  %v420_v11 = vmax.f32 %v234_v4, %v418_v9  ;;  %v444_v13 = vmul.f32 1.442695, %v442_v8 }
 0x247   :  { %604 = vpow2.f32 %v428_v10  ;;  %v427_v14 = vsub.f32 %v224_v54, %v420_v11  ;;  %v443_v15 = vsub.f32 %v409_v60, %v420_v11 }
 0x248   :  { %606 = vpow2.f32 %v444_v13 }
 0x249   :  { %v430_v16 = vmul.f32 1.442695, %v427_v14  ;;  %v446_v17 = vmul.f32 1.442695, %v443_v15 }
 0x24b   :  { %608 = vpow2.f32 %v430_v16 }
 0x24c   :  { %610 = vpow2.f32 %v446_v17 }
 0x251   :  { %v605_v18 = vpop.eup %604 }
 0x252   :  { %v434_v19 = vsel %vm425_vm12, %v605_v18, 0.0  ;;  %v607_v21 = vpop.eup %606 }
 0x253   :  { %v436_v20 = vsel %vm228_vm11, %v434_v19, 0.0  ;;  %v448_v25 = vsel %vm228_vm11, %v607_v21, 0.0 }
 0x254   :  { %437 = vadd.xlane.f32.xlu0 %v436_v20 }
 0x255   :  { %v609_v22 = vpop.eup %608 }
 0x256   :  { %v435_v23 = vsel %vm425_vm12, %v609_v22, 0.0  ;;  %v611_v26 = vpop.eup %610 }
 0x257   :  { %v439_v24 = vsel %vm228_vm11, %v435_v23, 0.0  ;;  %v451_v27 = vsel %vm228_vm11, %v611_v26, 0.0 }
 0x258   :  { %440 = vadd.xlane.f32.xlu1 %v439_v24  ;;  %449 = vadd.xlane.f32.xlu0 %v448_v25 }
 0x25c   :  { %452 = vadd.xlane.f32.xlu1 %v451_v27 }
 0x2e1   :  { %v438_v28 = vpop.xlane.xlu0 %437 }
 0x2e5   :  { %v441_v29 = vpop.xlane.xlu1 %440  ;;  %v450_v30 = vpop.xlane.xlu0 %449 }
 0x2e6   :  { %v454_v31 = vadd.f32 %v450_v30, %v438_v28 }
 0x2e8   :  { %612 = vlog2.f32 %v454_v31 }
 0x2e9   :  { %v453_v32 = vpop.xlane.xlu1 %452 }
 0x2ea   :  { %v455_v33 = vadd.f32 %v453_v32, %v441_v29 }
 0x2ec   :  { %614 = vlog2.f32 %v455_v33 }
 0x2f2   :  { %v613_v34 = vpop.eup %612 }
 0x2f3   :  { %v457_v35 = vmul.f32 0.6931472, %v613_v34 }
 0x2f5   :  { %v460_v36 = vsub.f32 %v426_v7, %v457_v35 }
 0x2f6   :  { %v615_v37 = vpop.eup %614 }
 0x2f7   :  { %v459_v38 = vmul.f32 0.6931472, %v615_v37  ;;  %v462_v39 = vsel %vm425_vm12, %v460_v36, 0.0 }
 0x2f8   :  { %v464_v40 = vsel %vm228_vm11, %v462_v39, 0.0 }
 0x2f9   :  { %465 = vadd.xlane.f32.xlu0 %v464_v40  ;;  %v461_v41 = vsub.f32 %v427_v14, %v459_v38 }
 0x2fb   :  { %v463_v42 = vsel %vm425_vm12, %v461_v41, 0.0 }
 0x2fc   :  { %v467_v43 = vsel %vm228_vm11, %v463_v42, 0.0 }
 0x2fd   :  { %468 = vadd.xlane.f32.xlu1 %v467_v43 }
 0x386   :  { %v466_v44 = vpop.xlane.xlu0 %465 }
 0x387   :  { %v470_v45 = vmul.f32 0.33333334, %v466_v44 }
 0x389   :  { %v472_v46 = vsub.f32 0.0, %v470_v45 }
 0x38a   :  { %v469_v47 = vpop.xlane.xlu1 %468 }
 0x38b   :  { %vm474_vm13 = vcmp.gt.f32.partialorder %v472_v46, 0.0  ;;  %v471_v48 = vmul.f32 0.33333334, %v469_v47 }
 0x38c   :  { %v551_v50 = vsel %vm474_vm13, 1.0, %v694_v12  ;;  %v497_v51 = vsel %vm474_vm13, %v472_v46, 0.0 }
 0x38d   :  { %v473_v49 = vsub.f32 0.0, %v471_v48  ;;  %v485_v54 = vrot.slane %v551_v50, %v780_v2  ;;  %v504_v55 = vrot.slane %v497_v51, %v780_v2 }
 0x38f   :  { %vm475_vm14 = vcmp.gt.f32.partialorder %v473_v49, 0.0 }
 0x390   :  { %v552_v52 = vsel %vm475_vm14, 1.0, %v694_v12  ;;  %v498_v53 = vsel %vm475_vm14, %v473_v49, 0.0 }
 0x391   :  { %v489_v56 = vrot.slane %v552_v52, %v780_v2  ;;  %v508_v57 = vrot.slane %v498_v53, %v780_v2 }
 0x393   :  { %v509_v58 = vsel %vm490_vm15, %v508_v57, %v504_v55  ;;  %v491_v59 = vsel %vm490_vm15, %v489_v56, %v485_v54 }
 0x394   :  { %v511_v60 = vsel %vm493_vm0, %v509_v58, 0.0  ;;  %v494_v61 = vsel %vm493_vm0, %v491_v59, 0.0 }
 0x395   :  { %512 = vadd.xlane.f32.xlu1 %v511_v60  ;;  %495 = vadd.xlane.f32.xlu0 %v494_v61 }
 0x422   :  { %v496_v62 = vpop.xlane.xlu0 %495  ;;  %v513_v0 = vpop.xlane.xlu1 %512 }
 0x423   :  { %v515_v63 = vmax.f32 %v496_v62, 1.0  ;;  %vm514_vm1 = vcmp.ge.f32.partialorder %v496_v62, 1.0 }
 0x425   :  { %616 = vrcp.f32 %v515_v63 }
 0x42f   :  { %v617_v12 = vpop.eup %616 }
 0x430   :  { %v517_v1 = vmul.f32 %v617_v12, %v513_v0 }
 0x432   :  { %v518_v3 = vsel %vm514_vm1, %v517_v1, 0.0 }
 0x433   :  { %v523_v4 = vrot.slane %v518_v3, %v780_v2 }
 0x435   :  { %526 = vst.msk [vmem:[#allocation7] sm:$0x1] %vm525_vm2, %v523_v4 }
 0x436   :  { %673 = shalt.err (!%p670_p6)
}
 0x437   :  { %s674_s11 = scalar_lea.hbm %s813_s2, 16 }
 0x438   :  { %p675_p7 = scmp.ne.s32.totalorder %s813_s2, %s674_s11  ;;  %p678_p8 = scmp.lt.u32.totalorder %s674_s11, %s813_s2 }
 0x43a   :  { %p680_p9 = pnand %p678_p8, %p675_p7 }
 0x43c   :  { %683 = shalt.err (!%p680_p9)
}
 0x43d   :  { %536 = dma.vmem_to_hbm [thread:$0]  %s534_s6, 16, %s813_s2, [#allocation4]  }
 0x43e   :  { %688 = dma.done.wait [#allocation4], 16  }
 0x43f   :  { %689 = vsyncadd [#allocation4], 4294967280 }
 0x440   :  { %540 = vsyncpa [#allocation3], 1 }
 0x441   :  { %541 = vsyncpa [#allocation6], 1 }
 0x442   :  { %542 = vsyncpa [#allocation4], 1 }

</bundles_post_ra>
